<compile_context>
chip_gen: v6e
topology: v6e:2x2x1
jax: 0.10.0
libtpu: 0.0.40
codegen_flags: <defaults>
</compile_context>

<pallas_src>
import jax
import jax.numpy as jnp
from jax.experimental import pallas as pl
from jax.experimental.pallas import tpu as pltpu


def ffn_kernel(x_ref, w1_ref, b1_ref, w2_ref, b2_ref, o_ref, acc_ref):
    f = pl.program_id(1)

    @pl.when(f == 0)
    def _init():
        acc_ref[...] = jnp.zeros_like(acc_ref)

    # fc1 chunk: (TM, Hp) @ (Hp, TF) with f32 MXU accumulation, + bias1, ReLU.
    h = jnp.dot(x_ref[...], w1_ref[...], preferred_element_type=jnp.float32)
    h = jnp.maximum(h + b1_ref[...].astype(jnp.float32), 0.0)
    # TODO(synk): dropout is identity here (inference / eval mode); training-mode
    # stochastic masking would use pltpu.prng_seed + pltpu.prng_random_bits.

    # fc2 partial: (TM, TF) @ (TF, Hp), accumulated into f32 VMEM scratch.
    acc_ref[...] += jnp.dot(h.astype(w2_ref.dtype), w2_ref[...],
                            preferred_element_type=jnp.float32)

    @pl.when(f == pl.num_programs(1) - 1)
    def _store():
        o_ref[...] = (acc_ref[...] + b2_ref[...].astype(jnp.float32)).astype(o_ref.dtype)


def _round_up(a, b):
    return (a + b - 1) // b * b


def _vmem_capacity_bytes():
    """Generation-aware VMEM capacity (falls back to v7x's 64 MiB, the smallest)."""
    try:
        info = pltpu.get_tpu_info()
        for name in ("vmem_capacity_bytes", "vmem_size_bytes", "vmem_bytes"):
            v = getattr(info, name, None)
            if v:
                return int(v)
    except Exception:
        pass
    return 64 << 20


def _choose_tiles(M, Hp, Fp, x_item, w_item, b_item, out_item, min_tm, budget):
    """Pick (TM, TF) so the double-buffered working set fits the VMEM budget."""
    m_cap = max(min_tm, _round_up(M, min_tm))
    tm_cands = sorted({min(t, m_cap) for t in (1024, 512, 256, 128, 64, 32, 16, 8)
                       if t >= min_tm}, reverse=True)
    tf_cands = sorted({min(t, Fp) for t in (4096, 2048, 1024, 512, 256, 128)},
                      reverse=True)

    def vmem_usage(tm, tf):
        return (2 * tm * Hp * x_item        # x tile (double-buffered)
                + 2 * Hp * tf * w_item      # w1 chunk (double-buffered)
                + 2 * tf * Hp * w_item      # w2 chunk (double-buffered)
                + 2 * tf * b_item           # b1 chunk
                + 2 * Hp * b_item           # b2
                + 2 * tm * Hp * out_item    # out tile (double-buffered)
                + tm * Hp * 4               # f32 accumulator scratch
                + tm * tf * (4 + w_item))   # f32 intermediate h + downcast copy

    for tm in tm_cands:            # prioritize big row tiles (fewer weight re-streams)
        for tf in tf_cands:        # then the largest FFN chunk that still fits
            if vmem_usage(tm, tf) <= budget:
                return tm, tf
    return min_tm, min(128, Fp)


def feed_forward(x, w1, b1, w2, b2, *, use_bf16=False):
    """x: (B, S, H); w1: (H, F); b1: (F,); w2: (F, H); b2: (H,).

    Weights are (in_dim, out_dim), i.e. the transpose of PyTorch's nn.Linear
    weight; computes relu(x @ w1 + b1) @ w2 + b2 (dropout = identity).
    If use_bf16, x/w1/w2 are cast to bf16 (f32 MXU accumulation kept, biases
    stay in their original dtype); output dtype follows the original x dtype.
    """
    B, S, H = x.shape
    F_dim = w1.shape[1]
    M = B * S
    out_dtype = x.dtype

    if use_bf16:
        x = x.astype(jnp.bfloat16)
        w1 = w1.astype(jnp.bfloat16)
        w2 = w2.astype(jnp.bfloat16)

    x_item = jnp.dtype(x.dtype).itemsize
    w_item = jnp.dtype(w1.dtype).itemsize
    b_item = jnp.dtype(b1.dtype).itemsize
    out_item = jnp.dtype(out_dtype).itemsize
    # dtype-aware sublane-packing floor for the row tile.
    min_tm = {4: 8, 2: 16, 1: 32}.get(x_item, 8)

    # Lane-dense padding on the MXU-facing dims.
    Hp = _round_up(H, 128)
    Fp = _round_up(F_dim, 128)

    vmem_cap = _vmem_capacity_bytes()
    vmem_budget = int(vmem_cap * 0.70)
    vmem_limit = min(int(vmem_cap * 0.85), vmem_cap - (6 << 20))

    TM, TF = _choose_tiles(M, Hp, Fp, x_item, w_item, b_item, out_item,
                           min_tm, vmem_budget)
    Fp2 = _round_up(Fp, TF)
    grid_f = Fp2 // TF

    # Keep the "parallel" M axis >= 2 steps when it is free to do so (weights
    # fully resident), so v7x's second TensorCore has work.
    # TODO(synk): detect v7x explicitly and apply this even when grid_f > 1.
    if grid_f == 1 and pl.cdiv(M, TM) == 1 and M > min_tm:
        TM = max(min_tm, _round_up(-(-M // 2), min_tm))
    grid_m = pl.cdiv(M, TM)

    # Pad parameters (exact: zero-padded rows/cols/bias entries contribute 0).
    x2 = x.reshape(M, H)
    if Hp != H:
        x2 = jnp.pad(x2, ((0, 0), (0, Hp - H)))
    w1p = jnp.pad(w1, ((0, Hp - H), (0, Fp2 - F_dim))) if (Hp, Fp2) != (H, F_dim) else w1
    w2p = jnp.pad(w2, ((0, Fp2 - F_dim), (0, Hp - H))) if (Fp2, Hp) != (F_dim, H) else w2
    b1p = jnp.pad(b1, (0, Fp2 - F_dim)).reshape(1, Fp2)
    b2p = jnp.pad(b2, (0, Hp - H)).reshape(1, Hp)

    weight_bytes = (Hp * Fp2 + Fp2 * Hp) * w_item + (Fp2 + Hp) * b_item
    flops = 4 * M * Hp * Fp2
    bytes_accessed = (M * Hp * x_item + M * Hp * out_item
                      + weight_bytes * (grid_m if grid_f > 1 else 1))

    out = pl.pallas_call(
        ffn_kernel,
        out_shape=jax.ShapeDtypeStruct((M, Hp), out_dtype),
        grid=(grid_m, grid_f),
        in_specs=[
            pl.BlockSpec((TM, Hp), lambda i, f: (i, 0)),   # x tile (resident across f)
            pl.BlockSpec((Hp, TF), lambda i, f: (0, f)),   # w1 chunk, streamed over f
            pl.BlockSpec((1, TF), lambda i, f: (0, f)),    # b1 chunk
            pl.BlockSpec((TF, Hp), lambda i, f: (f, 0)),   # w2 chunk, streamed over f
            pl.BlockSpec((1, Hp), lambda i, f: (0, 0)),    # b2 (resident)
        ],
        out_specs=pl.BlockSpec((TM, Hp), lambda i, f: (i, 0)),
        scratch_shapes=[pltpu.VMEM((TM, Hp), jnp.float32)],
        compiler_params=pltpu.CompilerParams(
            dimension_semantics=("parallel", "arbitrary"),
            vmem_limit_bytes=vmem_limit,
        ),
        cost_estimate=pl.CostEstimate(
            flops=flops, transcendentals=0, bytes_accessed=bytes_accessed),
    )(x2, w1p, b1p, w2p, b2p)

    if Hp != H:
        out = out[:, :H]
    return out.reshape(B, S, H)


if __name__ == "__main__":
    # Small shapes consistent with the module's forward:
    # x = [batch size, sentence length, hidden dim]
    batch, seq, hidden_dim, ffn_dim = 2, 8, 32, 64

    key = jax.random.PRNGKey(0)
    kx, kw1, kb1, kw2, kb2 = jax.random.split(key, 5)

    x = jax.random.normal(kx, (batch, seq, hidden_dim), dtype=jnp.float32)
    # Deterministic synthetic parameters (nn.Linear-like scale).
    w1 = jax.random.normal(kw1, (hidden_dim, ffn_dim), dtype=jnp.float32) * (
        1.0 / jnp.sqrt(hidden_dim)
    )
    b1 = jax.random.normal(kb1, (ffn_dim,), dtype=jnp.float32) * 0.01
    w2 = jax.random.normal(kw2, (ffn_dim, hidden_dim), dtype=jnp.float32) * (
        1.0 / jnp.sqrt(ffn_dim)
    )
    b2 = jax.random.normal(kb2, (hidden_dim,), dtype=jnp.float32) * 0.01

    out = feed_forward(x, w1, b1, w2, b2)
    out = jax.block_until_ready(out)

    # Pure-JAX reference check (fp32 path -> tight tolerance).
    ref = jnp.maximum(x @ w1 + b1, 0.0) @ w2 + b2
    assert out.shape == (batch, seq, hidden_dim)
    assert jnp.allclose(out, ref, atol=1e-5, rtol=1e-5)

    print("KERNEL_OK")
</pallas_src>

<mosaic_0001>
module attributes {stable_mosaic.version = 11 : i64} {
  func.func @ffn_kernel(%arg0: i32, %arg1: i32, %arg2: memref<8x128xf32, #tpu.memory_space<vmem>>, %arg3: memref<128x128xf32, #tpu.memory_space<vmem>>, %arg4: memref<1x128xf32, #tpu.memory_space<vmem>>, %arg5: memref<128x128xf32, #tpu.memory_space<vmem>>, %arg6: memref<1x128xf32, #tpu.memory_space<vmem>>, %arg7: memref<8x128xf32, #tpu.memory_space<vmem>>, %arg8: memref<8x128xf32, #tpu.memory_space<vmem>>) attributes {dimension_semantics = [#tpu.dimension_semantics<parallel>, #tpu.dimension_semantics<arbitrary>], iteration_bounds = array<i64: 2, 1>, scalar_prefetch = 0 : i64, scratch_operands = 1 : i64, tpu.core_type = #tpu.core_type<tc>, window_params = [{transform_indices = @transform_0, window_bounds = array<i64: 8, 128>}, {transform_indices = @transform_1, window_bounds = array<i64: 128, 128>}, {transform_indices = @transform_2, window_bounds = array<i64: 1, 128>}, {transform_indices = @transform_3, window_bounds = array<i64: 128, 128>}, {pipeline_mode = #tpu.pipeline_mode<synchronous>, transform_indices = @transform_4, window_bounds = array<i64: 1, 128>}, {transform_indices = @transform_5, window_bounds = array<i64: 8, 128>}]} {
    %c0_i32 = arith.constant 0 : i32
    %0 = arith.cmpi eq, %arg1, %c0_i32 : i32
    %1 = arith.extui %0 : i1 to i32
    %c0_i32_0 = arith.constant 0 : i32
    %2 = arith.cmpi ne, %1, %c0_i32_0 : i32
    scf.if %2 {
      %cst_16 = arith.constant 0.000000e+00 : f32
      %19 = vector.broadcast %cst_16 : f32 to vector<8x128xf32>
      %c0_17 = arith.constant 0 : index
      %c0_18 = arith.constant 0 : index
      %20 = vector.load %arg8[%c0_17, %c0_18] : memref<8x128xf32, #tpu.memory_space<vmem>>, vector<8x128xf32>
      tpu.vector_store %arg8[%c0_17, %c0_18], %19 {strides = array<i32>} : memref<8x128xf32, #tpu.memory_space<vmem>>, vector<8x128xf32>,
    } else {
    }
    %c0 = arith.constant 0 : index
    %c0_1 = arith.constant 0 : index
    %3 = vector.load %arg2[%c0, %c0_1] : memref<8x128xf32, #tpu.memory_space<vmem>>, vector<8x128xf32>
    %c0_2 = arith.constant 0 : index
    %c0_3 = arith.constant 0 : index
    %4 = vector.load %arg3[%c0_2, %c0_3] : memref<128x128xf32, #tpu.memory_space<vmem>>, vector<128x128xf32>
    %cst = arith.constant dense<0.000000e+00> : vector<8x128xf32>
    %5 = tpu.matmul %3, %4, %cst {dimension_numbers = #tpu.dot_dimension_numbers<[1], [0], [0], [1], [0, 0, 1, 1], [], []>} : vector<8x128xf32>, vector<128x128xf32>, vector<8x128xf32> -> vector<8x128xf32>
    %c0_4 = arith.constant 0 : index
    %c0_5 = arith.constant 0 : index
    %6 = vector.load %arg4[%c0_4, %c0_5] : memref<1x128xf32, #tpu.memory_space<vmem>>, vector<1x128xf32>
    %7 = vector.broadcast %6 : vector<1x128xf32> to vector<8x128xf32>
    %8 = arith.addf %5, %7 : vector<8x128xf32>
    %cst_6 = arith.constant 0.000000e+00 : f32
    %9 = vector.broadcast %cst_6 : f32 to vector<8x128xf32>
    %10 = arith.maximumf %8, %9 : vector<8x128xf32>
    %c0_7 = arith.constant 0 : index
    %c0_8 = arith.constant 0 : index
    %11 = vector.load %arg8[%c0_7, %c0_8] : memref<8x128xf32, #tpu.memory_space<vmem>>, vector<8x128xf32>
    %c0_9 = arith.constant 0 : index
    %c0_10 = arith.constant 0 : index
    %12 = vector.load %arg5[%c0_9, %c0_10] : memref<128x128xf32, #tpu.memory_space<vmem>>, vector<128x128xf32>
    %cst_11 = arith.constant dense<0.000000e+00> : vector<8x128xf32>
    %13 = tpu.matmul %10, %12, %cst_11 {dimension_numbers = #tpu.dot_dimension_numbers<[1], [0], [0], [1], [0, 0, 1, 1], [], []>} : vector<8x128xf32>, vector<128x128xf32>, vector<8x128xf32> -> vector<8x128xf32>
    %14 = arith.addf %11, %13 : vector<8x128xf32>
    %c0_12 = arith.constant 0 : index
    %c0_13 = arith.constant 0 : index
    %15 = vector.load %arg8[%c0_12, %c0_13] : memref<8x128xf32, #tpu.memory_space<vmem>>, vector<8x128xf32>
    tpu.vector_store %arg8[%c0_12, %c0_13], %14 {strides = array<i32>} : memref<8x128xf32, #tpu.memory_space<vmem>>, vector<8x128xf32>,
    %c0_i32_14 = arith.constant 0 : i32
    %16 = arith.cmpi eq, %arg1, %c0_i32_14 : i32
    %17 = arith.extui %16 : i1 to i32
    %c0_i32_15 = arith.constant 0 : i32
    %18 = arith.cmpi ne, %17, %c0_i32_15 : i32
    scf.if %18 {
      %c0_16 = arith.constant 0 : index
      %c0_17 = arith.constant 0 : index
      %19 = vector.load %arg8[%c0_16, %c0_17] : memref<8x128xf32, #tpu.memory_space<vmem>>, vector<8x128xf32>
      %c0_18 = arith.constant 0 : index
      %c0_19 = arith.constant 0 : index
      %20 = vector.load %arg6[%c0_18, %c0_19] : memref<1x128xf32, #tpu.memory_space<vmem>>, vector<1x128xf32>
      %21 = vector.broadcast %20 : vector<1x128xf32> to vector<8x128xf32>
      %22 = arith.addf %19, %21 : vector<8x128xf32>
      %c0_20 = arith.constant 0 : index
      %c0_21 = arith.constant 0 : index
      %23 = vector.load %arg7[%c0_20, %c0_21] : memref<8x128xf32, #tpu.memory_space<vmem>>, vector<8x128xf32>
      tpu.vector_store %arg7[%c0_20, %c0_21], %22 {strides = array<i32>} : memref<8x128xf32, #tpu.memory_space<vmem>>, vector<8x128xf32>,
    } else {
    }
    return
  }
  func.func @transform_0(%arg0: i32, %arg1: i32) -> (i32, i32) {
    %c0_i32 = arith.constant 0 : i32
    %c0_i32_0 = arith.constant 0 : i32
    return %arg0, %c0_i32 : i32, i32
  }
  func.func @transform_1(%arg0: i32, %arg1: i32) -> (i32, i32) {
    %c0_i32 = arith.constant 0 : i32
    %c0_i32_0 = arith.constant 0 : i32
    return %c0_i32, %arg1 : i32, i32
  }
  func.func @transform_2(%arg0: i32, %arg1: i32) -> (i32, i32) {
    %c0_i32 = arith.constant 0 : i32
    %c0_i32_0 = arith.constant 0 : i32
    return %c0_i32, %arg1 : i32, i32
  }
  func.func @transform_3(%arg0: i32, %arg1: i32) -> (i32, i32) {
    %c0_i32 = arith.constant 0 : i32
    %c0_i32_0 = arith.constant 0 : i32
    return %arg1, %c0_i32 : i32, i32
  }
  func.func @transform_4(%arg0: i32, %arg1: i32) -> (i32, i32) {
    %c0_i32 = arith.constant 0 : i32
    %c0_i32_0 = arith.constant 0 : i32
    %c0_i32_1 = arith.constant 0 : i32
    return %c0_i32, %c0_i32_0 : i32, i32
  }
  func.func @transform_5(%arg0: i32, %arg1: i32) -> (i32, i32) {
    %c0_i32 = arith.constant 0 : i32
    %c0_i32_0 = arith.constant 0 : i32
    return %arg0, %c0_i32 : i32, i32
  }
}

</mosaic_0001>

<bundles_post_ra>
// kernel: tpu_custom_call.1
= control target key start
LH: loop header
LB: loop body
LE: loop exit
PB: predicated region body
PF: predicated region fallthrough
CT: control target
= control target key end

     0   :  { %s1282_s0 = inlined_call_operand.hbm [shape: f32[16,128], index: 0, kind: input, shape index: {}]   ;;  %s1283_s1 = inlined_call_operand.hbm [shape: f32[128,128], index: 1, kind: input, shape index: {}]   ;;  %s1284_s2 = inlined_call_operand.vmem [shape: f32[1,128], index: 2, kind: input, shape index: {}]   ;;  %s1285_s3 = inlined_call_operand.hbm [shape: f32[128,128], index: 3, kind: input, shape index: {}]   ;;  %s1286_s4 = inlined_call_operand.vmem [shape: f32[1,128], index: 4, kind: input, shape index: {}]   ;;  %s1287_s5 = inlined_call_operand.hbm [shape: f32[16,128], index: 5, kind: output, shape index: {}]  }
   0x1   :  { %1291 = sst [smem:[#allocation13_spill]] %s1283_s1 }
   0x2   :  { %10 = vsyncpa [#allocation4], 0 }
   0x3   :  { %12 = vsyncpa [#allocation4 + $0x1], 0 }
   0x4   :  { %13 = vsyncpa [#allocation7], 0 }
   0x5   :  { %14 = vsyncpa [#allocation5], 0 }
   0x6   :  { %16 = vsyncpa [#allocation5 + $0x1], 0  ;;  %s1055_s18 = smov 0   ;;  %s1057_s19 = smov 0  }
   0x7   :  { %s1059_s20 = smov 0   ;;  %s1061_s21 = smov 0  }
   0x8   :  { %s1063_s22 = smov 0   ;;  %s1065_s23 = smov 0  }
   0x9 LB: > { %s640_s24 = sadd.s32 4294967295, %s1015_s23   ;;  %s641_s25 = sadd.s32 4294967294, %s1015_s23   ;;  %s1015_s23 = sphi %s1065_s23, %s22_s23   ;;  %s1011_s22 = sphi %s1063_s22, %s1309_s22   ;;  %s1007_s21 = sphi %s1061_s21, %s1308_s21   ;;  %s1003_s20 = sphi %s1059_s20, %s1307_s20   ;;  %s999_s19 = sphi %s1057_s19, %s1306_s19   ;;  %s995_s18 = sphi %s1055_s18, %s1305_s18  }
   0xa   : > { %p54_p0 = scmp.ne.s32.totalorder %s999_s19, %s995_s18  ;;  %p1089_p1 = scmp.eq.s32.totalorder %s640_s24, 0 }
   0xb   : > { %p1093_p2 = scmp.eq.s32.totalorder %s640_s24, 1  ;;  %p183_p3 = scmp.eq.s32.totalorder %s641_s25, 1 }
   0xc   : > { %s1292_s26 = scalar_select %p1089_p1, 1, 0 }
   0xd   : > { %p1099_p4 = por %p1089_p1, %p54_p0  ;;  %p642_p5 = scmp.ge.s32.totalorder %s1015_s23, 1 }
   0xe   : > { %p1104_p6 = por %p183_p3, %p54_p0  ;;  %p190_p7 = scmp.lt.s32.totalorder %s1015_s23, 3 }
   0xf   : > { %s1294_s28 = scalar_select %p1099_p4, 1, 0 }
  0x10   : > { %s1295_s29 = scalar_select %p1104_p6, 1, 0 }
  0x11   : > { %p1109_p8 = pnand %p642_p5, %p190_p7  ;;  %s1017_s6 = smov [#allocation6]  }
  0x12   : > { %s204_s7 = sshll.u32 %s1017_s6, 4  ;;  %s1018_s9 = smov [#allocation8]   ;;  %s205_s7 = int_to_ptr.vmem [resolvable:$true] %s204_s7 }
  0x13   : > { %p776_p9 = pneg %p1109_p8  ;;  %s226_s10 = sshll.u32 %s1018_s9, 4  ;;  %s227_s10 = int_to_ptr.vmem [resolvable:$true] %s226_s10 }
  0x14   : > { %s862_s11 = scalar_lea.vmem %s205_s7, 2048  ;;  %p870_p5 = scmp.lt.s32.totalorder %s205_s7, %s205_s7 }
  0x15   : > { %p1118_p11 = pnand %p776_p9, %p1089_p1  ;;  %p863_p13 = scmp.ne.s32.totalorder %s205_s7, %s862_s11 }
  0x16   : > { %p871_p7 = scmp.lt.s32.totalorder %s862_s11, %s862_s11 }
  0x17   : > { %p853_p12 = pneg %p1118_p11 }
  0x18   : > { %p872_p10 = por %p871_p7, %p870_p5 }
  0x19   : > { %p865_p0 = pnand %p863_p13, %p853_p12 }
  0x1b   : > { %p866_p3 = pneg %p865_p0 }
  0x1d   : > { %p873_p9 = pnand %p872_p10, %p866_p3 }
  0x1f   : > { %876 = shalt.err (!%p873_p9)
}
  0x20   : > { %s1019_s12 = smov 128   ;;  %s1020_s13 = smov 8  }
  0x21   : > { %s1298_s1 = sld [smem:[#allocation13_spill]]  ;;  %s888_s16 = scalar_lea.vmem %s227_s10, 2048 }
  0x22   : > { %p889_p6 = scmp.ne.s32.totalorder %s227_s10, %s888_s16  ;;  %p896_p1 = scmp.lt.s32.totalorder %s227_s10, %s227_s10 }
  0x23   : > { %p897_p4 = scmp.lt.s32.totalorder %s888_s16, %s888_s16 }
  0x24   : > { %p891_p13 = pnand %p889_p6, %p853_p12 }
  0x25   : > { %p898_p5 = por %p897_p4, %p896_p1 }
  0x26   : > { %p892_p0 = pneg %p891_p13 }
  0x27   : > { %779 = dma.hbm_to_vmem [thread:$0]  (!%p1118_p11), %s1298_s1, 2048, %s205_s7, [#allocation7], %s1019_s12, %s1019_s12, %s1020_s13  }
  0x28   : > { %p899_p10 = pnand %p898_p5, %p892_p0 }
  0x2a   : > { %902 = shalt.err (!%p899_p10)
}
  0x2b   : > { %782 = dma.hbm_to_vmem [thread:$0]  (!%p1118_p11), %s1285_s3, 2048, %s227_s10, [#allocation7], %s1019_s12, %s1019_s12, %s1020_s13  }
  0x2c   : > { %s34_s25 = sadd.s32 1, %s1011_s22  ;;  %s41_s6 = sadd.s32 1, %s1003_s20 }
  0x2d   : > { %p36_p1 = scmp.ge.s32.totalorder %s34_s25, 2  ;;  %p48_p4 = scmp.ne.s32.totalorder %s1003_s20, %s999_s19 }
  0x2e   : > { %p49_p6 = scmp.eq.s32.totalorder %s1015_s23, 0  ;;  %p793_p12 = scmp.lt.s32.totalorder %s1015_s23, 2 }
  0x2f   : > { %s1311_s25 = smov (%p36_p1, %s34_s25), 0  ;;  %p1150_p7 = por %p1093_p2, %p48_p4 }
  0x30   : > { %p50_p3 = por %p49_p6, %p48_p4  ;;  %s38_s8 = ssub.s32 %s1011_s22, %s1311_s25 }
  0x31   : > { %s243_s9 = sand.u32 1, %s1003_s20   ;;  %p39_p9 = scmp.eq.s32.totalorder %s38_s8, 0 }
  0x32   : > { %s647_s10 = sshll.u32 %s243_s9, 3  ;;  %s648_s11 = sshll.u32 %s1011_s22, 7 }
  0x33   : > { %s1159_s12 = scalar_select %p39_p9, %s1003_s20, %s41_s6  }
  0x34   : > { %s252_s15 = scalar_lea.hbm %s1282_s0, %s648_s11  ;;  %s247_s16 = scalar_lea.vmem [#allocation3], %s647_s10 }
  0x35   : > { %s254_s17 = sshll.u32 %s247_s16, 4  ;;  %p1166_p11 = pnand %p793_p12, %p50_p3  ;;  %s255_s17 = int_to_ptr.vmem [resolvable:$true] %s254_s17 }
  0x36   : > { %s244_s24 = scalar_lea.sflag [#allocation4], %s243_s9  ;;  %s916_s8 = scalar_lea.vmem %s255_s17, 128 }
  0x37   : > { %p905_p2 = pneg %p1166_p11  ;;  %p917_p13 = scmp.ne.s32.totalorder %s255_s17, %s916_s8 }
  0x38   : > { %s1021_s6 = smov [#allocation3]  }
  0x39   : > { %p919_p0 = pnand %p917_p13, %p905_p2  ;;  %s921_s1 = sshll.u32 %s1021_s6, 4  ;;  %s922_s1 = int_to_ptr.vmem [resolvable:$false] %s921_s1 }
  0x3a   : > { %s923_s11 = scalar_lea.vmem %s922_s1, 256  ;;  %p924_p10 = scmp.lt.s32.totalorder %s255_s17, %s922_s1 }
  0x3b   : > { %p920_p5 = pneg %p919_p0  ;;  %p925_p1 = scmp.lt.s32.totalorder %s923_s11, %s916_s8 }
  0x3d   : > { %p926_p4 = por %p925_p1, %p924_p10 }
  0x3f   : > { %p927_p6 = pnand %p926_p4, %p920_p5 }
  0x41   : > { %930 = shalt.err (!%p927_p6)
}
  0x42   : > { %786 = dma.hbm_to_vmem [thread:$0]  (!%p1166_p11), %s252_s15, 128, %s255_s17, %s244_s24  }
  0x43   : > { %263 = sbr.rel (%p1109_p8) target bundleno = 515 (0x203), region = 40  ;;  %s1177_s9 = sand.u32 (!%p1109_p8), 1, %s999_s19  }
  0x44   : > { %s650_s10 = sshll.u32 (!%p1109_p8), %s1177_s9, 3  ;;  %s266_s13 = scalar_lea.sflag (!%p1109_p8), [#allocation4], %s1177_s9 }
  0x45   : > { %s1183_s1 = scalar_lea.vmem (!%p1109_p8), [#allocation3], %s650_s10  ;;  %p1301_p12 = scmp.ne.s32.totalorder (!%p1109_p8), %s1294_s28, 0 }
  0x48   : > { %982 = dma.done.wait (%p1301_p12), %s266_s13, 128  }
  0x49   : > { %984 = vsyncadd (%p1301_p12), %s266_s13, 4294967168  ;;  %p1302_p3 = scmp.ne.s32.totalorder %s1292_s26, 0 }
  0x4b   : > { %986 = dma.done.wait (%p1302_p3), [#allocation7], 4096  }
  0x4c   : > { %988 = vsyncadd (%p1302_p3), [#allocation7], 4294963200  ;;  %v1022_v0 = vmov 0.0   ;;  %vm1023_vm0 = vmmov 0   ;;  %v332_v1 = vld [vmem:[#allocation6 + $0x78] sm:$0xff]  ;;  %v331_v2 = vld [vmem:[#allocation6 + $0x70] sm:$0xff] }
  0x4d   : > { %694 = vmatprep.subr.mxu0 %v1022_v0  ;;  %726 = vmatprep.mubr.msk.f32.mxu0 %vm1023_vm0, %v1022_v0  ;;  %v330_v3 = vld [vmem:[#allocation6 + $0x68] sm:$0xff]  ;;  %v329_v4 = vld [vmem:[#allocation6 + $0x60] sm:$0xff]  ;;  %v427_v5 = vld [vmem:[#allocation8 + $0x78] sm:$0xff]  ;;  %s657_s15 = sshll.u32 %s1007_s21, 7  ;;  %s306_s16 = scalar_lea.vmem [#allocation9], %s650_s10 }
  0x4e   : > { %729 = vmatprep.subr.mxu1 %v1022_v0  ;;  %761 = vmatprep.mubr.msk.f32.mxu1 %vm1023_vm0, %v1022_v0  ;;  %v328_v6 = vld [vmem:[#allocation6 + $0x58] sm:$0xff]  ;;  %v426_v7 = vld [vmem:[#allocation8 + $0x70] sm:$0xff]  ;;  %v425_v8 = vld [vmem:[#allocation8 + $0x68] sm:$0xff]  ;;  %s527_s17 = sshll.u32 %s306_s16, 4  ;;  %s1240_s8 = scalar_lea.hbm %s1287_s5, %s657_s15  ;;  %s528_s17 = int_to_ptr.vmem [resolvable:$true] %s527_s17 }
  0x4f   : > { %695 = vmatpush3.msra.mxu0 %v332_v1  ;;  %730 = vmatpush3.msra.mxu1 %v427_v5  ;;  %v327_v9 = vld [vmem:[#allocation6 + $0x50] sm:$0xff]  ;;  %v424_v10 = vld [vmem:[#allocation8 + $0x60] sm:$0xff]  ;;  %v326_v11 = vld [vmem:[#allocation6 + $0x48] sm:$0xff]  ;;  %s514_s6 = scalar_lea.sflag [#allocation5], %s1177_s9  ;;  %s931_s11 = scalar_lea.vmem %s528_s17, 128 }
  0x50   : > { %696 = vmatprep.subr.mxu0 %v1022_v0  ;;  %731 = vmatprep.subr.mxu1 %v1022_v0  ;;  %v423_v12 = vld [vmem:[#allocation8 + $0x58] sm:$0xff]  ;;  %v325_v13 = vld [vmem:[#allocation6 + $0x40] sm:$0xff]  ;;  %v422_v14 = vld [vmem:[#allocation8 + $0x50] sm:$0xff]  ;;  %p932_p8 = scmp.ne.s32.totalorder %s528_s17, %s931_s11  ;;  %s1024_s21 = smov [#allocation9]  }
  0x51   : > { %697 = vmatpush3.msra.mxu0 %v331_v2  ;;  %732 = vmatpush3.msra.mxu1 %v426_v7  ;;  %v324_v15 = vld [vmem:[#allocation6 + $0x38] sm:$0xff]  ;;  %v421_v16 = vld [vmem:[#allocation8 + $0x48] sm:$0xff]  ;;  %v323_v17 = vld [vmem:[#allocation6 + $0x30] sm:$0xff]  ;;  %s935_s13 = sshll.u32 %s1024_s21, 4  ;;  %s936_s13 = int_to_ptr.vmem [resolvable:$false] %s935_s13 }
  0x52   : > { %698 = vmatprep.subr.mxu0 %v1022_v0  ;;  %733 = vmatprep.subr.mxu1 %v1022_v0  ;;  %v420_v18 = vld [vmem:[#allocation8 + $0x40] sm:$0xff]  ;;  %v322_v19 = vld [vmem:[#allocation6 + $0x28] sm:$0xff]  ;;  %v419_v20 = vld [vmem:[#allocation8 + $0x38] sm:$0xff]  ;;  %p933_p9 = pnand %p932_p8, %p1150_p7  ;;  %s937_s10 = scalar_lea.vmem %s936_s13, 256 }
  0x53   : > { %699 = vmatpush3.msra.mxu0 %v330_v3  ;;  %734 = vmatpush3.msra.mxu1 %v425_v8  ;;  %v321_v21 = vld [vmem:[#allocation6 + $0x20] sm:$0xff]  ;;  %v418_v22 = vld [vmem:[#allocation8 + $0x30] sm:$0xff]  ;;  %v320_v23 = vld [vmem:[#allocation6 + $0x18] sm:$0xff]  ;;  %p938_p2 = scmp.lt.s32.totalorder %s528_s17, %s936_s13  ;;  %p939_p13 = scmp.lt.s32.totalorder %s937_s10, %s931_s11 }
  0x54   : > { %700 = vmatprep.subr.mxu0 %v1022_v0  ;;  %735 = vmatprep.subr.mxu1 %v1022_v0  ;;  %v417_v24 = vld [vmem:[#allocation8 + $0x28] sm:$0xff]  ;;  %v319_v25 = vld [vmem:[#allocation6 + $0x10] sm:$0xff]  ;;  %v416_v26 = vld [vmem:[#allocation8 + $0x20] sm:$0xff]  ;;  %p934_p11 = pneg %p933_p9 }
  0x55   : > { %701 = vmatpush3.msra.mxu0 %v329_v4  ;;  %736 = vmatpush3.msra.mxu1 %v424_v10  ;;  %v318_v27 = vld [vmem:[#allocation6 + $0x8] sm:$0xff]  ;;  %v415_v28 = vld [vmem:[#allocation8 + $0x18] sm:$0xff]  ;;  %v317_v29 = vld [vmem:[#allocation6] sm:$0xff]  ;;  %p940_p0 = por %p939_p13, %p938_p2 }
  0x56   : > { %702 = vmatprep.subr.mxu0 %v1022_v0  ;;  %737 = vmatprep.subr.mxu1 %v1022_v0  ;;  %v316_v30 = vld [vmem:[%s1183_s1] sm:$0xff]  ;;  %v413_v32 = vld [vmem:[#allocation8 + $0x8] sm:$0xff]  ;;  %v412_v33 = vld [vmem:[#allocation8] sm:$0xff] }
  0x57   : > { %703 = vmatpush3.msra.mxu0 %v328_v6  ;;  %738 = vmatpush3.msra.mxu1 %v423_v12  ;;  %v414_v31 = vld [vmem:[#allocation8 + $0x10] sm:$0xff]  ;;  %p941_p5 = pnand %p940_p0, %p934_p11 }
  0x58   : > { %704 = vmatprep.subr.mxu0 %v1022_v0  ;;  %739 = vmatprep.subr.mxu1 %v1022_v0  ;;  %v654_v34 = vld [vmem:[%s1284_s2] ss:$0 sm:$0xff] }
  0x59   : > { %705 = vmatpush3.msra.mxu0 %v327_v9  ;;  %740 = vmatpush3.msra.mxu1 %v422_v14  ;;  %v655_v39 = vld [vmem:[%s1286_s4] ss:$0 sm:$0xff] }
  0x5a   : > { %706 = vmatprep.subr.mxu0 %v1022_v0  ;;  %741 = vmatprep.subr.mxu1 %v1022_v0 }
  0x5b   : > { %707 = vmatpush3.msra.mxu0 %v326_v11  ;;  %742 = vmatpush3.msra.mxu1 %v421_v16 }
  0x5c   : > { %708 = vmatprep.subr.mxu0 %v1022_v0  ;;  %743 = vmatprep.subr.mxu1 %v1022_v0 }
  0x5d   : > { %709 = vmatpush3.msra.mxu0 %v325_v13  ;;  %744 = vmatpush3.msra.mxu1 %v420_v18 }
  0x5e   : > { %710 = vmatprep.subr.mxu0 %v1022_v0  ;;  %745 = vmatprep.subr.mxu1 %v1022_v0 }
  0x5f   : > { %711 = vmatpush3.msra.mxu0 %v324_v15  ;;  %746 = vmatpush3.msra.mxu1 %v419_v20 }
  0x60   : > { %712 = vmatprep.subr.mxu0 %v1022_v0  ;;  %747 = vmatprep.subr.mxu1 %v1022_v0 }
  0x61   : > { %713 = vmatpush3.msra.mxu0 %v323_v17  ;;  %748 = vmatpush3.msra.mxu1 %v418_v22 }
  0x62   : > { %714 = vmatprep.subr.mxu0 %v1022_v0  ;;  %749 = vmatprep.subr.mxu1 %v1022_v0 }
  0x63   : > { %715 = vmatpush3.msra.mxu0 %v322_v19  ;;  %750 = vmatpush3.msra.mxu1 %v417_v24 }
  0x64   : > { %716 = vmatprep.subr.mxu0 %v1022_v0  ;;  %751 = vmatprep.subr.mxu1 %v1022_v0 }
  0x65   : > { %717 = vmatpush3.msra.mxu0 %v321_v21  ;;  %752 = vmatpush3.msra.mxu1 %v416_v26 }
  0x66   : > { %718 = vmatprep.subr.mxu0 %v1022_v0  ;;  %753 = vmatprep.subr.mxu1 %v1022_v0 }
  0x67   : > { %719 = vmatpush3.msra.mxu0 %v320_v23  ;;  %754 = vmatpush3.msra.mxu1 %v415_v28 }
  0x68   : > { %720 = vmatprep.subr.mxu0 %v1022_v0  ;;  %755 = vmatprep.subr.mxu1 %v1022_v0 }
  0x69   : > { %721 = vmatpush3.msra.mxu0 %v319_v25  ;;  %756 = vmatpush3.msra.mxu1 %v414_v31 }
  0x6a   : > { %722 = vmatprep.subr.mxu0 %v1022_v0  ;;  %757 = vmatprep.subr.mxu1 %v1022_v0 }
  0x6b   : > { %723 = vmatpush3.msra.mxu0 %v318_v27  ;;  %758 = vmatpush3.msra.mxu1 %v413_v32 }
  0x6c   : > { %724 = vmatprep.subr.mxu0 %v1022_v0  ;;  %759 = vmatprep.subr.mxu1 %v1022_v0 }
  0x6d   : > { %725 = vmatpush3.msra.mxu0 %v317_v29  ;;  %760 = vmatpush3.msra.mxu1 %v412_v33 }
  0x6e   : > { %727 = vmatmul.mubr.f32.vlgmr.msra.gmra.mxu0 %v316_v30 }
 0x12e   : > { %v406_v35 = vpop.f32.mrf.mxu0 }
 0x12f   : > { %v407_v36 = vadd.f32 %v654_v34, %v406_v35 }
 0x130   : > { %v728_v37 = vpop.f32.mrf.mxu0 }
 0x131   : > { %v410_v38 = vmax.f32 %v407_v36, 0.0 }
 0x133   : > { %762 = vmatmul.mubr.f32.vlgmr.msra.gmra.mxu1 %v410_v38 }
 0x1f3   : > { %v494_v40 = vpop.f32.mrf.mxu1 }
 0x1f4   : > { %v511_v41 = vadd.f32 %v655_v39, %v494_v40 }
 0x1f5   : > { %v763_v42 = vpop.f32.mrf.mxu1 }
 0x1f6   : > { %512 = vst [vmem:[%s306_s16] sm:$0xff] %v511_v41 }
 0x1f7   : > { %944 = shalt.err (!%p941_p5)
}
 0x1f8   : > { %s945_s1 = scalar_lea.hbm %s1240_s8, 128  ;;  %s949_s28 = scalar_lea.hbm %s1287_s5, 256 }
 0x1f9   : > { %p946_p10 = scmp.ne.s32.totalorder %s1240_s8, %s945_s1  ;;  %p950_p6 = scmp.lt.s32.totalorder %s1240_s8, %s1287_s5 }
 0x1fa   : > { %p951_p12 = scmp.lt.s32.totalorder %s949_s28, %s945_s1 }
 0x1fb   : > { %p947_p1 = pnand %p946_p10, %p1150_p7 }
 0x1fc   : > { %p952_p3 = por %p951_p12, %p950_p6 }
 0x1fd   : > { %p948_p4 = pneg %p947_p1 }
 0x1ff   : > { %p953_p8 = pnand %p952_p3, %p948_p4 }
 0x201   : > { %956 = shalt.err (!%p953_p8)
}
 0x202   : > { %774 = dma.vmem_to_hbm [thread:$0]  (%p1150_p7), %s528_s17, 128, %s1240_s8, %s514_s6  }
 0x203 PF: > { %s539_s15 = sand.u32 1, %s995_s18   ;;  %p1303_p9 = scmp.ne.s32.totalorder %s1295_s29, 0 }
 0x204   : > { %p1304_p11 = scmp.ge.s32.totalorder %s1015_s23, 2  ;;  %s540_s16 = scalar_lea.sflag [#allocation5], %s539_s15 }
 0x206   : > { %p788_p2 = pnand %p1304_p11, %p1303_p9 }
 0x208   : > { %p789_p13 = pneg %p788_p2 }
 0x20a   : > { %990 = dma.done.wait (%p789_p13), %s540_s16, 128  }
 0x20b   : > { %992 = vsyncadd (%p789_p13), %s540_s16, 4294967168  ;;  %s22_s23 = sadd.s32 1, %s1015_s23   ;;  %s1305_s18 = smov %s999_s19 }
 0x20c   : > { %p19_p0 = scmp.ge.s32.totalorder %s22_s23, 4   ;;  %s1306_s19 = smov %s1003_s20 }
 0x20d   : > { %s1307_s20 = smov %s1159_s12  ;;  %s1308_s21 = smov %s1011_s22 }
 0x20e   : > { %s1309_s22 = smov %s1311_s25  ;;  %21 = sbr.rel (!%p19_p0) target bundleno = 9 (0x9), region = 106 }
 0x213   :  { %545 = vsyncpa [#allocation4], 1 }
 0x214   :  { %547 = vsyncpa [#allocation4 + $0x1], 1 }
 0x215   :  { %548 = vsyncpa [#allocation7], 1 }
 0x216   :  { %549 = vsyncpa [#allocation5], 1 }
 0x217   :  { %551 = vsyncpa [#allocation5 + $0x1], 1 }

</bundles_post_ra>
